<compile_context>
chip_gen: v7x
topology: tpu7x:2x2x1
jax: 0.10.0
libtpu: 0.0.40
codegen_flags: <defaults>
</compile_context>

<pallas_src>
import functools

import jax
import jax.numpy as jnp
from jax.experimental import pallas as pl
from jax.experimental.pallas import tpu as pltpu


def _round_up(x, m):
    return ((x + m - 1) // m) * m


def _pick_tiles(B, F, x_itemsize, max_batch_tile):
    """Choose (TB, TF): batch tile and feature (reduction) tile."""
    # Feature tile: full F when modest, else the largest 128-multiple divisor.
    TF = F
    if F > 2048:
        for cand in (2048, 1024, 512, 256, 128):
            if F % cand == 0:
                TF = cand
                break
    # Batch tile: largest power of two whose double-buffered x stream fits in a
    # conservative ~8 MiB VMEM budget (safe on v5e 16 MiB / v6e 32 MiB / v7x 32 MiB scoped).
    budget = 8 * 1024 * 1024
    max_batch_tile = max(8, int(max_batch_tile))
    tb = 8
    for cand in (1024, 512, 256, 128, 64, 32, 16, 8):
        if cand <= max_batch_tile and 2 * cand * TF * x_itemsize <= budget:
            tb = cand
            break
    if tb >= B:
        # Whole batch fits in one tile: use the exact size (full-dim block is
        # always legal, no padding needed even if B is not a multiple of 8).
        return B, TF
    return tb, TF


def _tfslp_kernel(x_ref, w_ref, b_ref, o_ref, acc_ref, *, apply_sigmoid: bool):
    # x_ref: (TB, TF) native dtype; w_ref: (1, TF); b_ref: (1,) f32 in SMEM;
    # o_ref: (TB, 1) f32 (resident across the reduction axis); acc_ref: (TB, 1) f32.
    k = pl.program_id(1)

    @pl.when(k == 0)
    def _init():
        acc_ref[...] = jnp.zeros_like(acc_ref)

    # Mem-bound matvec: VPU elementwise multiply + XLU lane reduce, f32 accumulation.
    x = x_ref[...].astype(jnp.float32)
    w = w_ref[...].astype(jnp.float32)
    acc_ref[...] += jnp.sum(x * w, axis=-1, keepdims=True)

    @pl.when(k == pl.num_programs(1) - 1)
    def _epilogue():
        y = acc_ref[...] + b_ref[0]  # scalar bias from SMEM
        if apply_sigmoid:
            y = jax.nn.sigmoid(y)
        o_ref[...] = y.astype(o_ref.dtype)


def tfslp_forward(x_in, weight, bias, apply_sigmoid=False, *, max_batch_tile=1024):
    """Pallas equivalent of TFSLP.forward.

    x_in:   (B, ...) any trailing shape whose product == input_features (native dtype kept)
    weight: (1, F)  -- torch nn.Linear weight layout
    bias:   (1,)    -- torch nn.Linear bias
    returns squeezed f32 result ((B,) for B>1, scalar for B==1), sigmoid if requested.
    """
    B = x_in.shape[0]
    x2d = x_in.reshape(B, -1)                    # flatten(start_dim=1), keep native dtype
    F = x2d.shape[1]
    w2d = weight.reshape(1, F)                   # lane-dense weight, keep native dtype
    b1 = bias.reshape(1).astype(jnp.float32)     # single scalar -> SMEM

    TB, TF = _pick_tiles(B, F, x2d.dtype.itemsize, max_batch_tile)
    Bp = B if TB == B else _round_up(B, TB)
    if Bp != B:
        x2d = jnp.pad(x2d, ((0, Bp - B), (0, 0)))  # zero rows, sliced off afterwards

    grid = (Bp // TB, F // TF)
    kernel = functools.partial(_tfslp_kernel, apply_sigmoid=bool(apply_sigmoid))

    cost = pl.CostEstimate(
        flops=2 * B * F,
        transcendentals=B if apply_sigmoid else 0,
        bytes_accessed=B * F * x2d.dtype.itemsize + F * w2d.dtype.itemsize + B * 4,
    )

    y = pl.pallas_call(
        kernel,
        out_shape=jax.ShapeDtypeStruct((Bp, 1), jnp.float32),
        grid_spec=pltpu.PrefetchScalarGridSpec(
            num_scalar_prefetch=0,
            grid=grid,
            in_specs=[
                pl.BlockSpec((TB, TF), lambda i, k: (i, k)),        # x tiles stream (pipelined)
                pl.BlockSpec((1, TF), lambda i, k: (0, k)),         # weight tile, reused per batch tile
                pl.BlockSpec(memory_space=pltpu.MemorySpace.SMEM),  # bias scalar in SMEM
            ],
            out_specs=pl.BlockSpec((TB, 1), lambda i, k: (i, 0)),   # resident across reduction axis
            scratch_shapes=[pltpu.VMEM((TB, 1), jnp.float32)],
        ),
        compiler_params=pltpu.CompilerParams(
            dimension_semantics=("parallel", "arbitrary"),
            vmem_limit_bytes=32 * 1024 * 1024,
        ),
        cost_estimate=cost,
    )(x2d, w2d, b1)

    return jnp.squeeze(y[:B])  # matches torch .squeeze(): (B,) for B>1, scalar for B==1


if __name__ == "__main__":
    key = jax.random.PRNGKey(0)
    k_x, k_w, k_b, k_x2 = jax.random.split(key, 4)

    input_features = 256
    # x shaped like a small feature map: (batch=2, channels=4, 8, 8) -> 256 flat features
    x = jax.random.normal(k_x, (2, 4, 8, 8), dtype=jnp.float32)

    # Deterministic synthetic Linear(256, 1) params (torch-style shapes).
    bound = 1.0 / jnp.sqrt(jnp.float32(input_features))
    weight = jax.random.uniform(k_w, (1, input_features), jnp.float32, -bound, bound)
    bias = jax.random.uniform(k_b, (1,), jnp.float32, -bound, bound)

    def ref(xx, sig=False):
        yy = (xx.reshape(xx.shape[0], -1).astype(jnp.float32) @ weight.T + bias).reshape(-1)
        return jax.nn.sigmoid(yy) if sig else yy

    # 1) f32 run, both branches.
    y = tfslp_forward(x, weight, bias, apply_sigmoid=False)
    y_sig = tfslp_forward(x, weight, bias, apply_sigmoid=True)
    jax.block_until_ready(y)
    jax.block_until_ready(y_sig)
    assert y.shape == (2,)
    assert jnp.allclose(y, ref(x), atol=1e-5, rtol=1e-5)
    assert jnp.allclose(y_sig, ref(x, True), atol=1e-5, rtol=1e-5)

    # 2) Native bf16 activations (no wrapper upcast; f32 accumulation in-kernel).
    x_bf16 = x.astype(jnp.bfloat16)
    y_bf16 = tfslp_forward(x_bf16, weight, bias, apply_sigmoid=False)
    jax.block_until_ready(y_bf16)
    assert jnp.allclose(y_bf16, ref(x_bf16), atol=5e-2, rtol=5e-2)

    # 3) Batch that doesn't divide the tile (exercises the padded multi-tile path).
    x_big = jax.random.normal(k_x2, (19, 4, 8, 8), dtype=jnp.float32)
    y_big = tfslp_forward(x_big, weight, bias, apply_sigmoid=True, max_batch_tile=8)
    jax.block_until_ready(y_big)
    assert y_big.shape == (19,)
    assert jnp.allclose(y_big, ref(x_big, True), atol=1e-5, rtol=1e-5)

    print("KERNEL_OK")
</pallas_src>

<mosaic_0001>
module attributes {stable_mosaic.version = 11 : i64} {
  func.func @_tfslp_kernel(%arg0: i32, %arg1: i32, %arg2: memref<2x256xf32, #tpu.memory_space<vmem>>, %arg3: memref<1x256xf32, #tpu.memory_space<vmem>>, %arg4: memref<1xf32, #tpu.memory_space<smem>>, %arg5: memref<2x1xf32, #tpu.memory_space<vmem>>, %arg6: memref<2x1xf32, #tpu.memory_space<vmem>>) attributes {dimension_semantics = [#tpu.dimension_semantics<parallel>, #tpu.dimension_semantics<arbitrary>], iteration_bounds = array<i64: 1, 1>, scalar_prefetch = 0 : i64, scratch_operands = 1 : i64, tpu.core_type = #tpu.core_type<tc>, window_params = [{transform_indices = @transform_0, window_bounds = array<i64: 2, 256>}, {transform_indices = @transform_1, window_bounds = array<i64: 1, 256>}, {transform_indices = @transform_2, window_bounds = array<i64: 1>}, {transform_indices = @transform_3, window_bounds = array<i64: 2, 1>}]} {
    %c0_i32 = arith.constant 0 : i32
    %0 = arith.cmpi eq, %arg1, %c0_i32 : i32
    %1 = arith.extui %0 : i1 to i32
    %c0_i32_0 = arith.constant 0 : i32
    %2 = arith.cmpi ne, %1, %c0_i32_0 : i32
    scf.if %2 {
      %cst_10 = arith.constant 0.000000e+00 : f32
      %15 = vector.broadcast %cst_10 : f32 to vector<2x1xf32>
      %c0_11 = arith.constant 0 : index
      %c0_12 = arith.constant 0 : index
      %16 = vector.load %arg6[%c0_11, %c0_12] : memref<2x1xf32, #tpu.memory_space<vmem>>, vector<2x1xf32>
      tpu.vector_store %arg6[%c0_11, %c0_12], %15 {strides = array<i32>} : memref<2x1xf32, #tpu.memory_space<vmem>>, vector<2x1xf32>,
    } else {
    }
    %c0 = arith.constant 0 : index
    %c0_1 = arith.constant 0 : index
    %3 = vector.load %arg2[%c0, %c0_1] : memref<2x256xf32, #tpu.memory_space<vmem>>, vector<2x256xf32>
    %c0_2 = arith.constant 0 : index
    %c0_3 = arith.constant 0 : index
    %4 = vector.load %arg3[%c0_2, %c0_3] : memref<1x256xf32, #tpu.memory_space<vmem>>, vector<1x256xf32>
    %c0_4 = arith.constant 0 : index
    %c0_5 = arith.constant 0 : index
    %5 = vector.load %arg6[%c0_4, %c0_5] : memref<2x1xf32, #tpu.memory_space<vmem>>, vector<2x1xf32>
    %6 = vector.broadcast %4 : vector<1x256xf32> to vector<2x256xf32>
    %7 = arith.mulf %3, %6 : vector<2x256xf32>
    %cst = arith.constant dense<0.000000e+00> : vector<2xf32>
    %8 = vector.multi_reduction <add>, %7, %cst [1] : vector<2x256xf32> to vector<2xf32>
    %9 = vector.shape_cast %8 : vector<2xf32> to vector<2x1xf32>
    %10 = arith.addf %5, %9 : vector<2x1xf32>
    %c0_6 = arith.constant 0 : index
    %c0_7 = arith.constant 0 : index
    %11 = vector.load %arg6[%c0_6, %c0_7] : memref<2x1xf32, #tpu.memory_space<vmem>>, vector<2x1xf32>
    tpu.vector_store %arg6[%c0_6, %c0_7], %10 {strides = array<i32>} : memref<2x1xf32, #tpu.memory_space<vmem>>, vector<2x1xf32>,
    %c0_i32_8 = arith.constant 0 : i32
    %12 = arith.cmpi eq, %arg1, %c0_i32_8 : i32
    %13 = arith.extui %12 : i1 to i32
    %c0_i32_9 = arith.constant 0 : i32
    %14 = arith.cmpi ne, %13, %c0_i32_9 : i32
    scf.if %14 {
      %c0_10 = arith.constant 0 : index
      %c0_11 = arith.constant 0 : index
      %15 = vector.load %arg6[%c0_10, %c0_11] : memref<2x1xf32, #tpu.memory_space<vmem>>, vector<2x1xf32>
      %c0_12 = arith.constant 0 : index
      %16 = memref.load %arg4[%c0_12] : memref<1xf32, #tpu.memory_space<smem>>
      %17 = vector.broadcast %16 : f32 to vector<2x1xf32>
      %18 = arith.addf %15, %17 : vector<2x1xf32>
      %c0_13 = arith.constant 0 : index
      %c0_14 = arith.constant 0 : index
      %19 = vector.load %arg5[%c0_13, %c0_14] : memref<2x1xf32, #tpu.memory_space<vmem>>, vector<2x1xf32>
      tpu.vector_store %arg5[%c0_13, %c0_14], %18 {strides = array<i32>} : memref<2x1xf32, #tpu.memory_space<vmem>>, vector<2x1xf32>,
    } else {
    }
    return
  }
  func.func @transform_0(%arg0: i32, %arg1: i32) -> (i32, i32) {
    %c0_i32 = arith.constant 0 : i32
    return %arg0, %arg1 : i32, i32
  }
  func.func @transform_1(%arg0: i32, %arg1: i32) -> (i32, i32) {
    %c0_i32 = arith.constant 0 : i32
    %c0_i32_0 = arith.constant 0 : i32
    return %c0_i32, %arg1 : i32, i32
  }
  func.func @transform_2(%arg0: i32, %arg1: i32) -> i32 {
    %c0_i32 = arith.constant 0 : i32
    %c0_i32_0 = arith.constant 0 : i32
    return %c0_i32 : i32
  }
  func.func @transform_3(%arg0: i32, %arg1: i32) -> (i32, i32) {
    %c0_i32 = arith.constant 0 : i32
    %c0_i32_0 = arith.constant 0 : i32
    return %arg0, %c0_i32 : i32, i32
  }
}

</mosaic_0001>

<bundles_post_ra>
// kernel: tpu_custom_call.1
= control target key start
LH: loop header
LB: loop body
LE: loop exit
PB: predicated region body
PF: predicated region fallthrough
CT: control target
= control target key end

     0   :  { %9 = vsyncpa [#allocation5], 0  ;;  %s115_s12 = smov [#allocation4]   ;;  %s162_s0 = inlined_call_operand.hbm [shape: f32[2,256], index: 0, kind: input, shape index: {}]   ;;  %s163_s1 = inlined_call_operand.vmem [shape: f32[1,256], index: 1, kind: input, shape index: {}]   ;;  %s164_s2 = inlined_call_operand.<no memory space> [shape: f32[1], index: 2, kind: input, shape index: {}]   ;;  %s165_s3 = inlined_call_operand.vmem [shape: f32[2,1], index: 3, kind: output, shape index: {}]  }
   0x1   :  { %s16_s13 = sshll.u32 %s115_s12, 4  ;;  %s91_s16 = scalar_lea.hbm %s162_s0, 64  ;;  %s17_s13 = int_to_ptr.vmem [resolvable:$true] %s16_s13 }
   0x2   :  { %p92_p0 = scmp.ne.s32.totalorder %s162_s0, %s91_s16  ;;  %p95_p1 = scmp.lt.u32.totalorder %s91_s16, %s162_s0 }
   0x4   :  { %p97_p2 = pnand %p95_p1, %p92_p0 }
   0x6   :  { %100 = shalt.err (!%p97_p2)
}
   0x7   :  { %s101_s21 = scalar_lea.vmem %s17_s13, 64  ;;  %p106_p4 = scmp.lt.s32.totalorder %s17_s13, %s17_s13 }
   0x8   :  { %p102_p3 = scmp.ne.s32.totalorder %s17_s13, %s101_s21  ;;  %p107_p5 = scmp.lt.s32.totalorder %s101_s21, %s101_s21 }
   0xa   :  { %p108_p6 = por %p107_p5, %p106_p4 }
   0xc   :  { %p109_p7 = pnand %p108_p6, %p102_p3 }
   0xe   :  { %112 = shalt.err (!%p109_p7)
}
   0xf   :  { %19 = dma.hbm_to_vmem [thread:$0]  %s162_s0, 64, %s17_s13, [#allocation5]  }
  0x10   :  { %113 = dma.done.wait [#allocation5], 64  }
  0x11   :  { %114 = vsyncadd [#allocation5], 4294967232  ;;  %vm31_vm0 = vcmask 1024   ;;  %v37_v0 = vlaneseq  ;;  %v116_v1 = vmov 0.0   ;;  %v117_v2 = vmov 1983009808  }
  0x12   :  { %32 = vst.msk [vmem:[#allocation2] sm:$0x3] %vm31_vm0, %v116_v1  ;;  %v47_v3 = vunpack.c.l.s4 %v117_v2  ;;  %v34_v8 = vld [vmem:[%s163_s1] sm:$0x3]  ;;  %v33_v13 = vld [vmem:[#allocation4] sm:$0xf]  ;;  %v80_v24 = vstv %s164_s2 }
  0x13   :  { %v38_v4 = vshrl.u32 %v37_v0, 7  ;;  %vm66_vm1 = vcmask 1041408  }
  0x14   :  { %v48_v7 = vunpack.c.0.s8 %v47_v3 }
  0x15   :  { %v39_v5 = vsub.s32 0, %v38_v4  ;;  %v43_v6 = vsub.s32 1, %v38_v4 }
  0x16   :  { %v51_v11 = vsub.s32 %v48_v7, %v38_v4 }
  0x17   :  { %v40_v9 = vrot.slane %v34_v8, %v39_v5  ;;  %v44_v10 = vrot.slane %v34_v8, %v43_v6 }
  0x19   :  { %v45_v12 = vcombine.low %v40_v9, %v44_v10  ;;  %v35_v21 = vld [vmem:[#allocation2] sm:$0x3] }
  0x1b   :  { %v52_v14 = vrot.slane %v45_v12, %v51_v11 }
  0x1d   :  { %v54_v15 = vmul.f32 %v52_v14, %v33_v13 }
  0x1f   :  { %v62_v16 = vrot.slane %v54_v15, %v51_v11 }
  0x21   :  { %v63_v17 = vcombine.high %v62_v16, %v62_v16  ;;  %v67_v18 = vsel %vm66_vm1, %v62_v16, 0.0 }
  0x23   :  { %v68_v19 = vsel %vm66_vm1, %v63_v17, 0.0 }
  0x24   :  { %v69_v20 = vadd.f32 %v68_v19, %v67_v18 }
  0x26   :  { %70 = vadd.xlane.f32.xlu0 %v69_v20 }
  0xb3   :  { %v71_v22 = vpop.xlane.xlu0 %70 }
  0xb4   :  { %v72_v23 = vadd.f32 %v71_v22, %v35_v21 }
  0xb6   :  { %74 = vst.msk [vmem:[#allocation2] sm:$0x3] %vm31_vm0, %v72_v23 }
  0xbd   :  { %v78_v25 = vld [vmem:[#allocation2] sm:$0x3] }
  0xbe   :  { %v81_v26 = vadd.f32 %v80_v24, %v78_v25 }
  0xc0   :  { %82 = vst.msk [vmem:[%s165_s3] sm:$0x3] %vm31_vm0, %v81_v26 }
  0xc1   :  { %87 = vsyncpa [#allocation5], 1 }

</bundles_post_ra>
